<compile_context>
chip_gen: v6e
topology: v6e:2x2x1
jax: 0.10.0
libtpu: 0.0.40
codegen_flags: <defaults>
</compile_context>

<pallas_src>
import functools

import jax
import jax.numpy as jnp
from jax.experimental import pallas as pl
from jax.experimental.pallas import tpu as pltpu


def _round_up(x, m):
    return ((x + m - 1) // m) * m


def _vmem_capacity_bytes():
    """Physical VMEM per core; conservative 64 MiB fallback (v7x-sized)."""
    try:
        info = pltpu.get_tpu_info()
        cap = getattr(info, "vmem_capacity_bytes", None)
        if cap:
            return int(cap)
    except Exception:
        pass
    return 64 * 1024 * 1024


def _choose_tm(batch, target):
    """Batch tile: multiple of 8, <= target, minimizing (#tiles, padded batch).

    Avoids the old pathological collapse (e.g. B=520 -> tm=8); instead B is
    zero-padded by at most one tile-remainder.
    """
    b8 = _round_up(batch, 8)
    if b8 <= target:
        return b8, b8
    best = None
    for tm in range(target, 7, -8):
        bp = _round_up(b8, tm)
        key = (bp // tm, bp, -tm)
        if best is None or key < best[0]:
            best = (key, tm, bp)
    return best[1], best[2]


def _streamed_tiles(batch, n_k, tk, out_fp, n_seg, isz, out_isz, budget):
    """Tile choice when the folded weight cannot stay VMEM-resident.

    Large batch tiles first (arithmetic intensity ~ 2*tm/itemsize on the
    streamed weight), then as many whole segments per N tile as fit.
    """
    seg_divs = [d for d in range(n_seg, 0, -1) if n_seg % d == 0]
    for target in (512, 256, 128, 64, 32, 16, 8):
        tm, bp = _choose_tm(batch, target)
        for spt in seg_divs:
            tn = spt * out_fp
            n_j = n_seg // spt
            est = (2 * tm * tk * isz            # x tile, double-buffered
                   + 2 * tk * tn * isz          # weight tile, double-buffered
                   + 2 * tn * 4                 # bias row
                   + 2 * tm * out_fp * out_isz  # output tile
                   + (tm * tn * 4 if n_k > 1 else 0)      # acc_mm scratch
                   + (tm * out_fp * 4 if n_j > 1 else 0))  # acc_out scratch
            if est <= budget:
                return tm, bp, spt
    tm, bp = _choose_tm(batch, 8)
    return tm, bp, 1


def _anyf_linear_kernel(x_ref, w_ref, brow_ref, o_ref, *scratch,
                        out_fp, spt, single_j, single_k):
    """Grid = (batch tiles i, folded-N tiles j, K tiles k); k innermost.

    x_ref    : (tm, tk)         activation tile
    w_ref    : (tk, tn)         folded weight tile, tn = spt * out_fp
    brow_ref : (1, tn)   f32    precomputed per-column bias row (seg_bias[g]*s)
    o_ref    : (tm, out_fp)     output tile (resident across j and k)
    scratch  : [acc_mm (tm,tn) f32]   only when nk > 1
               [acc_out (tm,out_fp) f32]  only when nj > 1
    """
    j = pl.program_id(1)
    k = pl.program_id(2)
    nj = pl.num_programs(1)
    nk = pl.num_programs(2)

    si = 0
    acc_mm = None
    acc_out = None
    if not single_k:
        acc_mm = scratch[si]
        si += 1
    if not single_j:
        acc_out = scratch[si]
        si += 1

    # One lane-dense MXU matmul covering spt segments at once; f32 accumulation.
    mm = jnp.dot(x_ref[...], w_ref[...], preferred_element_type=jnp.float32)

    def epilogue(y_full):
        # Bias + relu, then fold the spt segment slices (static, 128-lane
        # aligned because out_fp % 128 == 0) into a (tm, out_fp) sum.
        y = jnp.maximum(y_full + brow_ref[...], 0.0)
        seg = y[:, 0:out_fp]
        for t in range(1, spt):
            seg = seg + y[:, t * out_fp:(t + 1) * out_fp]
        if single_j:
            o_ref[...] = seg.astype(o_ref.dtype)
        else:
            @pl.when(j == 0)
            def _():
                acc_out[...] = seg

            @pl.when(j != 0)
            def _():
                acc_out[...] += seg

            @pl.when(j == nj - 1)
            def _():
                o_ref[...] = acc_out[...].astype(o_ref.dtype)

    if single_k:
        epilogue(mm)
    else:
        @pl.when(k == 0)
        def _():
            acc_mm[...] = mm          # assign, not zero-init + add

        @pl.when(k != 0)
        def _():
            acc_mm[...] += mm

        @pl.when(k == nk - 1)
        def _():
            epilogue(acc_mm[...])


def anyf_linear(x, w, seg_bias, nbits=8, compute_dtype=jnp.bfloat16,
                block_sizes=None):
    """x: (B, in_f), w: (n_seg, in_f, out_f), seg_bias: (n_seg,).

    compute_dtype: MXU operand dtype (default bf16 on all generations; the MXU
    is bf16-native everywhere). Accumulation is always f32.
    block_sizes: optional (tm, tk, spt) override (tm % 8 == 0, tk % 128 == 0 or
    tk >= in_f, spt divides n_seg) — mainly for testing the tiled paths.
    """
    B, in_f = x.shape
    n_seg, _, out_f = w.shape
    nq = float(2 ** (nbits - 1) - 1)

    # QuantAct(symmetric, clamp_only=True): dynamic per-tensor max-abs clip.
    # clamp(x, -clip, clip) with clip = max|x| is an exact no-op, so only the
    # scale survives (folded into the precomputed bias row below).
    # TODO(synk): QuantAct source not provided; assumed dynamic per-tensor
    # max-abs symmetric clip (a learned/EMA or per-channel clip would change
    # both the clamp and s).
    # NOTE: this max-abs is one extra wrapper-side read of x; fuse it into the
    # producer of x when this layer is embedded in a larger jitted graph.
    clip = jnp.max(jnp.abs(x)).astype(jnp.float32)
    s_eff = (clip / nq) * nq                        # == clip; mirrors `s = s * n`

    cdtype = jnp.dtype(compute_dtype) if compute_dtype is not None else x.dtype
    isz = jnp.dtype(cdtype).itemsize
    out_isz = jnp.dtype(x.dtype).itemsize

    # Lane-dense padded fold: pad out_f to a multiple of 128 so segment slices,
    # the segment sum and the output store are unmasked 128-lane ops.
    out_fp = _round_up(out_f, 128)
    n_pad = n_seg * out_fp

    # Generation-aware VMEM budget (~105 MiB on v5e/v6e, ~52 MiB on v7x).
    cap = _vmem_capacity_bytes()
    vmem_limit = int(min(max(int(0.82 * cap), 32 * 1024 * 1024),
                         112 * 1024 * 1024))
    tile_budget = int(0.90 * vmem_limit)            # headroom for Mosaic scratch

    if block_sizes is not None:
        tm, tk, spt = block_sizes
        assert tm % 8 == 0 and n_seg % spt == 0
        bp = _round_up(B, tm)
        kp = _round_up(in_f, tk)
        assert tk == kp or tk % 128 == 0
    else:
        # Try weight residency first: single (j, k) block -> constant weight
        # index_map -> W DMA'd from HBM exactly once, reused by every batch
        # tile. 2x accounts for Pallas's default double-buffering allocation.
        tm_r, bp_r = _choose_tm(B, 256)
        resident_est = (2 * in_f * n_pad * isz
                        + 2 * tm_r * in_f * isz
                        + 2 * n_pad * 4
                        + 2 * tm_r * out_fp * out_isz)
        if resident_est <= tile_budget:
            tm, bp = tm_r, bp_r
            tk, kp = in_f, in_f
            spt = n_seg
        else:
            # Streamed-weight path: full K whenever modest (no tk->128
            # collapse), else 512-wide K tiles with zero-padding (exact).
            if in_f <= 2048:
                tk, kp = in_f, in_f
            else:
                tk = 512
                kp = _round_up(in_f, tk)
            tm, bp, spt = _streamed_tiles(B, kp // tk, tk, out_fp, n_seg,
                                          isz, out_isz, tile_budget)

    tn = spt * out_fp
    n_i, n_j, n_k = bp // tm, n_pad // tn, kp // tk
    single_j = (n_j == 1)
    single_k = (n_k == 1)

    # --- build padded, folded operands (all exact: zero padding) ---
    x_c = x.astype(cdtype)
    if bp != B or kp != in_f:
        x_c = jnp.pad(x_c, ((0, bp - B), (0, kp - in_f)))

    w_all = jnp.transpose(w, (1, 0, 2))             # (in_f, n_seg, out_f)
    if out_fp != out_f:
        w_all = jnp.pad(w_all, ((0, 0), (0, 0), (0, out_fp - out_f)))
    w_all = w_all.reshape(in_f, n_pad)
    if kp != in_f:
        w_all = jnp.pad(w_all, ((0, kp - in_f), (0, 0)))
    w_all = w_all.astype(cdtype)

    brow = jnp.broadcast_to((seg_bias.astype(jnp.float32) * s_eff)[:, None],
                            (n_seg, out_f))
    if out_fp != out_f:
        brow = jnp.pad(brow, ((0, 0), (0, out_fp - out_f)))  # padded cols -> 0
    brow = brow.reshape(1, n_pad)

    scratch_shapes = []
    if not single_k:
        scratch_shapes.append(pltpu.VMEM((tm, tn), jnp.float32))
    if not single_j:
        scratch_shapes.append(pltpu.VMEM((tm, out_fp), jnp.float32))

    kernel = functools.partial(_anyf_linear_kernel, out_fp=out_fp, spt=spt,
                               single_j=single_j, single_k=single_k)

    w_streams = 1 if (single_j and single_k) else n_i
    out_p = pl.pallas_call(
        kernel,
        out_shape=jax.ShapeDtypeStruct((bp, out_fp), x.dtype),
        grid_spec=pltpu.PrefetchScalarGridSpec(
            num_scalar_prefetch=0,
            grid=(n_i, n_j, n_k),
            in_specs=[
                pl.BlockSpec((tm, tk), lambda i, j, k: (i, k)),
                # Weight / bias index maps ignore the batch axis i; with a
                # single (j, k) block the index is constant, so the folded
                # weight is DMA'd once and stays VMEM-resident across batches.
                pl.BlockSpec((tk, tn), lambda i, j, k: (k, j)),
                pl.BlockSpec((1, tn), lambda i, j, k: (0, j)),
            ],
            out_specs=pl.BlockSpec((tm, out_fp), lambda i, j, k: (i, 0)),
            scratch_shapes=scratch_shapes,
        ),
        compiler_params=pltpu.CompilerParams(
            # Output accumulates across j and k -> arbitrary; batch tiles are
            # independent -> parallel (megacore / v7x dual-TC sharding).
            dimension_semantics=("parallel", "arbitrary", "arbitrary"),
            vmem_limit_bytes=vmem_limit,
        ),
        cost_estimate=pl.CostEstimate(
            flops=2 * bp * kp * n_pad,
            transcendentals=0,
            bytes_accessed=(bp * kp * isz
                            + kp * n_pad * isz * w_streams
                            + n_pad * 4
                            + bp * out_fp * out_isz),
        ),
    )(x_c, w_all, brow)

    return out_p[:B, :out_f]


def anyf_linear_ref(x, w, seg_bias, nbits=8):
    """Pure-JAX reference mirroring the PyTorch forward."""
    n = float(2 ** (nbits - 1) - 1)
    clip = jnp.max(jnp.abs(x))
    s = (clip / n) * n
    xc = jnp.clip(x, -clip, clip)
    outs = jnp.stack([xc @ w[i] for i in range(w.shape[0])], axis=1)
    outs = outs + seg_bias.reshape(1, -1, 1) * s
    outs = jax.nn.relu(outs)
    return outs.sum(axis=1)


if __name__ == "__main__":
    nbits = 8

    # --- 1. small demo shapes consistent with the module (f32 compute, tight) ---
    B, in_features, out_features, n_seg = 8, 32, 32, 2
    kx, kw = jax.random.split(jax.random.PRNGKey(0))
    x = jax.random.normal(kx, (B, in_features), dtype=jnp.float32)
    bound = 1.0 / (in_features ** 0.5)
    w = jax.random.uniform(kw, (n_seg, in_features, out_features),
                           minval=-bound, maxval=bound, dtype=jnp.float32)
    seg_bias = jnp.linspace(-1.0, 1.0, 2 * n_seg + 1)[1::2].astype(jnp.float32)

    out = jax.block_until_ready(
        anyf_linear(x, w, seg_bias, nbits=nbits, compute_dtype=jnp.float32))
    ref = anyf_linear_ref(x, w, seg_bias, nbits=nbits)
    assert out.shape == (B, out_features)
    assert jnp.allclose(out, ref, atol=1e-3, rtol=1e-3), "mismatch (small, f32)"

    # --- 2. larger config: VMEM-resident folded weight, >=2 batch tiles,
    #        default bf16 operands (looser tolerance vs f32 reference) ---
    B2, in2, out2, nseg2 = 512, 640, 640, 2
    k2x, k2w = jax.random.split(jax.random.PRNGKey(1))
    x2 = jax.random.normal(k2x, (B2, in2), dtype=jnp.float32)
    b2 = 1.0 / (in2 ** 0.5)
    w2 = jax.random.uniform(k2w, (nseg2, in2, out2), minval=-b2, maxval=b2,
                            dtype=jnp.float32)
    sb2 = jnp.linspace(-1.0, 1.0, 2 * nseg2 + 1)[1::2].astype(jnp.float32)
    out2_ = jax.block_until_ready(anyf_linear(x2, w2, sb2, nbits=nbits))
    ref2 = anyf_linear_ref(x2, w2, sb2, nbits=nbits)
    assert out2_.shape == (B2, out2)
    assert jnp.allclose(out2_, ref2, atol=1e-1, rtol=5e-2), "mismatch (resident bf16)"

    # --- 3. forced streamed tiling: exercises the K accumulator (acc_mm), the
    #        segment-tile accumulator (acc_out) and out_f padding (96 -> 128
    #        lanes); grid = (2, 3, 2), f32 for a tight check ---
    B3, in3, out3, nseg3 = 64, 256, 96, 3
    k3x, k3w = jax.random.split(jax.random.PRNGKey(2))
    x3 = jax.random.normal(k3x, (B3, in3), dtype=jnp.float32)
    b3 = 1.0 / (in3 ** 0.5)
    w3 = jax.random.uniform(k3w, (nseg3, in3, out3), minval=-b3, maxval=b3,
                            dtype=jnp.float32)
    sb3 = jnp.linspace(-1.0, 1.0, 2 * nseg3 + 1)[1::2].astype(jnp.float32)
    out3_ = jax.block_until_ready(
        anyf_linear(x3, w3, sb3, nbits=nbits, compute_dtype=jnp.float32,
                    block_sizes=(32, 128, 1)))
    ref3 = anyf_linear_ref(x3, w3, sb3, nbits=nbits)
    assert out3_.shape == (B3, out3)
    assert jnp.allclose(out3_, ref3, atol=2e-2, rtol=2e-2), "mismatch (streamed tiled)"

    print("KERNEL_OK")
</pallas_src>

<mosaic_0001>
module attributes {stable_mosaic.version = 11 : i64} {
  func.func @_anyf_linear_kernel(%arg0: i32, %arg1: i32, %arg2: i32, %arg3: memref<8x32xf32, #tpu.memory_space<vmem>>, %arg4: memref<32x256xf32, #tpu.memory_space<vmem>>, %arg5: memref<1x256xf32, #tpu.memory_space<vmem>>, %arg6: memref<8x128xf32, #tpu.memory_space<vmem>>) attributes {dimension_semantics = [#tpu.dimension_semantics<parallel>, #tpu.dimension_semantics<arbitrary>, #tpu.dimension_semantics<arbitrary>], iteration_bounds = array<i64: 1, 1, 1>, scalar_prefetch = 0 : i64, scratch_operands = 0 : i64, tpu.core_type = #tpu.core_type<tc>, window_params = [{transform_indices = @transform_0, window_bounds = array<i64: 8, 32>}, {transform_indices = @transform_1, window_bounds = array<i64: 32, 256>}, {transform_indices = @transform_2, window_bounds = array<i64: 1, 256>}, {transform_indices = @transform_3, window_bounds = array<i64: 8, 128>}]} {
    %c0 = arith.constant 0 : index
    %c0_0 = arith.constant 0 : index
    %0 = vector.load %arg3[%c0, %c0_0] : memref<8x32xf32, #tpu.memory_space<vmem>>, vector<8x32xf32>
    %c0_1 = arith.constant 0 : index
    %c0_2 = arith.constant 0 : index
    %1 = vector.load %arg4[%c0_1, %c0_2] : memref<32x256xf32, #tpu.memory_space<vmem>>, vector<32x256xf32>
    %cst = arith.constant dense<0.000000e+00> : vector<8x256xf32>
    %2 = tpu.matmul %0, %1, %cst {dimension_numbers = #tpu.dot_dimension_numbers<[1], [0], [0], [1], [0, 0, 1, 1], [], []>} : vector<8x32xf32>, vector<32x256xf32>, vector<8x256xf32> -> vector<8x256xf32>
    %c0_3 = arith.constant 0 : index
    %c0_4 = arith.constant 0 : index
    %3 = vector.load %arg5[%c0_3, %c0_4] : memref<1x256xf32, #tpu.memory_space<vmem>>, vector<1x256xf32>
    %4 = vector.broadcast %3 : vector<1x256xf32> to vector<8x256xf32>
    %5 = arith.addf %2, %4 : vector<8x256xf32>
    %cst_5 = arith.constant 0.000000e+00 : f32
    %6 = vector.broadcast %cst_5 : f32 to vector<8x256xf32>
    %7 = arith.maximumf %5, %6 : vector<8x256xf32>
    %8 = vector.extract_strided_slice %7 {offsets = [0, 0], sizes = [8, 128], strides = [1, 1]} : vector<8x256xf32> to vector<8x128xf32>
    %9 = vector.extract_strided_slice %7 {offsets = [0, 128], sizes = [8, 128], strides = [1, 1]} : vector<8x256xf32> to vector<8x128xf32>
    %10 = arith.addf %8, %9 : vector<8x128xf32>
    %c0_6 = arith.constant 0 : index
    %c0_7 = arith.constant 0 : index
    %11 = vector.load %arg6[%c0_6, %c0_7] : memref<8x128xf32, #tpu.memory_space<vmem>>, vector<8x128xf32>
    tpu.vector_store %arg6[%c0_6, %c0_7], %10 {strides = array<i32>} : memref<8x128xf32, #tpu.memory_space<vmem>>, vector<8x128xf32>,
    return
  }
  func.func @transform_0(%arg0: i32, %arg1: i32, %arg2: i32) -> (i32, i32) {
    %c0_i32 = arith.constant 0 : i32
    return %arg0, %arg2 : i32, i32
  }
  func.func @transform_1(%arg0: i32, %arg1: i32, %arg2: i32) -> (i32, i32) {
    %c0_i32 = arith.constant 0 : i32
    return %arg2, %arg1 : i32, i32
  }
  func.func @transform_2(%arg0: i32, %arg1: i32, %arg2: i32) -> (i32, i32) {
    %c0_i32 = arith.constant 0 : i32
    %c0_i32_0 = arith.constant 0 : i32
    return %c0_i32, %arg1 : i32, i32
  }
  func.func @transform_3(%arg0: i32, %arg1: i32, %arg2: i32) -> (i32, i32) {
    %c0_i32 = arith.constant 0 : i32
    %c0_i32_0 = arith.constant 0 : i32
    return %arg0, %c0_i32 : i32, i32
  }
}

</mosaic_0001>

<bundles_post_ra>
// kernel: tpu_custom_call.1
= control target key start
LH: loop header
LB: loop body
LE: loop exit
PB: predicated region body
PF: predicated region fallthrough
CT: control target
= control target key end

     0   :  { %8 = vsyncpa [#allocation3], 0  ;;  %s268_s0 = inlined_call_operand.hbm [shape: f32[8,32], index: 0, kind: input, shape index: {}]   ;;  %s269_s1 = inlined_call_operand.hbm [shape: f32[32,256], index: 1, kind: input, shape index: {}]   ;;  %s270_s2 = inlined_call_operand.vmem [shape: f32[1,256], index: 2, kind: input, shape index: {}]   ;;  %s271_s3 = inlined_call_operand.hbm [shape: f32[8,128], index: 3, kind: output, shape index: {}]  }
   0x1   :  { %9 = vsyncpa [#allocation6], 0 }
   0x2   :  { %10 = vsyncpa [#allocation4], 0  ;;  %s230_s12 = smov [#allocation2]   ;;  %s231_s14 = smov [#allocation5]  }
   0x3   :  { %s17_s13 = sshll.u32 %s230_s12, 4  ;;  %s26_s15 = sshll.u32 %s231_s14, 4  ;;  %s18_s13 = int_to_ptr.vmem [resolvable:$true] %s17_s13  ;;  %s27_s15 = int_to_ptr.vmem [resolvable:$true] %s26_s15 }
   0x4   :  { %s172_s16 = scalar_lea.vmem %s18_s13, 128  ;;  %p177_p1 = scmp.lt.s32.totalorder %s18_s13, %s18_s13 }
   0x5   :  { %p173_p0 = scmp.ne.s32.totalorder %s18_s13, %s172_s16  ;;  %p178_p2 = scmp.lt.s32.totalorder %s172_s16, %s172_s16 }
   0x7   :  { %p179_p3 = por %p178_p2, %p177_p1 }
   0x9   :  { %p180_p4 = pnand %p179_p3, %p173_p0 }
   0xb   :  { %183 = shalt.err (!%p180_p4)
}
   0xc   :  { %20 = dma.hbm_to_vmem [thread:$0]  %s268_s0, 128, %s18_s13, [#allocation3]  }
   0xd   :  { %s192_s19 = scalar_lea.vmem %s27_s15, 1024  ;;  %p197_p6 = scmp.lt.s32.totalorder %s27_s15, %s27_s15 }
   0xe   :  { %p193_p5 = scmp.ne.s32.totalorder %s27_s15, %s192_s19  ;;  %p198_p7 = scmp.lt.s32.totalorder %s192_s19, %s192_s19 }
  0x10   :  { %p199_p8 = por %p198_p7, %p197_p6 }
  0x12   :  { %p200_p9 = pnand %p199_p8, %p193_p5 }
  0x14   :  { %203 = shalt.err (!%p200_p9)
}
  0x15   :  { %s232_s20 = smov 256   ;;  %s233_s21 = smov 16  }
  0x16   :  { %32 = dma.hbm_to_vmem [thread:$0]  %s269_s1, 1024, %s27_s15, [#allocation6], %s232_s20, %s232_s20, %s233_s21  }
  0x17   :  { %224 = dma.done.wait [#allocation3], 128  }
  0x18   :  { %225 = vsyncadd [#allocation3], 4294967168 }
  0x19   :  { %226 = dma.done.wait [#allocation6], 1024  }
  0x1a   :  { %227 = vsyncadd [#allocation6], 4294966272  ;;  %v234_v0 = vmov 0.0   ;;  %v49_v1 = vld [vmem:[#allocation5 + $0x38] sm:$0xff]  ;;  %v48_v2 = vld [vmem:[#allocation5 + $0x30] sm:$0xff]  ;;  %vm62_vm0 = vcmask 261120   ;;  %v52_v10 = vlaneseq }
  0x1b   :  { %130 = vmatprep.mubr.f32.mxu0 %v234_v0  ;;  %v47_v3 = vld [vmem:[#allocation5 + $0x28] sm:$0xff]  ;;  %90 = vmatprep.subr.mxu0 %v49_v1  ;;  %v46_v4 = vld [vmem:[#allocation5 + $0x20] sm:$0xff]  ;;  %v45_v5 = vld [vmem:[#allocation5 + $0x18] sm:$0xff]  ;;  %s235_s24 = smov [#allocation7]  }
  0x1c   :  { %91 = vmatpush1.msra.mxu0 %v48_v2  ;;  %v44_v6 = vld [vmem:[#allocation5 + $0x10] sm:$0xff]  ;;  %v43_v7 = vld [vmem:[#allocation5 + $0x8] sm:$0xff]  ;;  %v42_v8 = vld [vmem:[#allocation5] sm:$0xff]  ;;  %v53_v11 = vshrl.u32 %v52_v10, 7  ;;  %s147_s25 = sshll.u32 %s235_s24, 4  ;;  %s148_s25 = int_to_ptr.vmem [resolvable:$true] %s147_s25 }
  0x1d   :  { %92 = vmatprep.subr.mxu0 %v47_v3  ;;  %v41_v9 = vld [vmem:[#allocation2] sm:$0xff]  ;;  %s204_s26 = scalar_lea.vmem %s148_s25, 128  ;;  %p209_p11 = scmp.lt.s32.totalorder %s148_s25, %s148_s25 }
  0x1e   :  { %93 = vmatpush1.msra.mxu0 %v46_v4  ;;  %v54_v12 = vsub.s32 0, %v53_v11  ;;  %v50_v13 = vld [vmem:[%s270_s2] sm:$0x3]  ;;  %v58_v14 = vsub.s32 1, %v53_v11  ;;  %p205_p10 = scmp.ne.s32.totalorder %s148_s25, %s204_s26  ;;  %p210_p12 = scmp.lt.s32.totalorder %s204_s26, %s204_s26 }
  0x1f   :  { %94 = vmatprep.subr.mxu0 %v45_v5 }
  0x20   :  { %95 = vmatpush1.msra.mxu0 %v44_v6  ;;  %v55_v15 = vrot.slane %v50_v13, %v54_v12  ;;  %v59_v16 = vrot.slane %v50_v13, %v58_v14  ;;  %p211_p13 = por %p210_p12, %p209_p11 }
  0x21   :  { %96 = vmatprep.subr.mxu0 %v43_v7 }
  0x22   :  { %97 = vmatpush1.msra.mxu0 %v42_v8  ;;  %p212_p0 = pnand %p211_p13, %p205_p10 }
  0x23   :  { %157 = vmatmul.mubr.msk.f32.vlgmr.msra.gmra.mxu0 %vm62_vm0, %v41_v9 }
  0xe3   :  { %v132_v17 = vpop.f32.mrf.mxu0 }
  0xe4   :  { %v133_v18 = vadd.f32 %v132_v17, %v55_v15 }
  0xe5   :  { %v134_v19 = vpop.f32.mrf.mxu0 }
  0xe6   :  { %v135_v20 = vadd.f32 %v134_v19, %v59_v16  ;;  %v137_v21 = vmax.f32 %v133_v18, 0.0 }
  0xe8   :  { %v138_v22 = vmax.f32 %v135_v20, 0.0 }
  0xea   :  { %v139_v23 = vadd.f32 %v138_v22, %v137_v21 }
  0xec   :  { %140 = vst [vmem:[#allocation7] sm:$0xff] %v139_v23 }
  0xed   :  { %215 = shalt.err (!%p212_p0)
}
  0xee   :  { %150 = dma.vmem_to_hbm [thread:$0]  %s148_s25, 128, %s271_s3, [#allocation4]  }
  0xef   :  { %228 = dma.done.wait [#allocation4], 128  }
  0xf0   :  { %229 = vsyncadd [#allocation4], 4294967168 }
  0xf1   :  { %154 = vsyncpa [#allocation3], 1 }
  0xf2   :  { %155 = vsyncpa [#allocation6], 1 }
  0xf3   :  { %156 = vsyncpa [#allocation4], 1 }

</bundles_post_ra>
